<compile_context>
chip_gen: v7x
topology: tpu7x:2x2x1
jax: 0.10.0
libtpu: 0.0.40
codegen_flags: <defaults>
</compile_context>

<pallas_src>
import functools

import jax
import jax.numpy as jnp
from jax import lax
from jax.experimental import pallas as pl
from jax.experimental.pallas import tpu as pltpu


# int32 bit-pattern constants (two's complement of the usual uint32 values).
_GOLDEN = -1640531527        # 0x9E3779B9
_MUR1 = -2048144789          # 0x85ebca6b
_MUR2 = -1028477387          # 0xc2b2ae35
_SIGN = -2147483648          # 0x80000000


def _lshr32(x, n):
    """Logical right shift of int32 lanes by static amount n."""
    return (x >> n) & jnp.int32((1 << (32 - n)) - 1)


def _mix32(h):
    """murmur3 finalizer; int32 wrap-around arithmetic == uint32 mod 2^32."""
    h = h ^ _lshr32(h, 16)
    h = h * jnp.int32(_MUR1)
    h = h ^ _lshr32(h, 13)
    h = h * jnp.int32(_MUR2)
    h = h ^ _lshr32(h, 16)
    return h


def _stable_dropout_kernel(seed_ref, x_ref, o_ref, *,
                           tile_rows, ncols, threshold_signed, scale):
    # Global flat element index for every lane of this tile.
    shape = x_ref.shape
    row = lax.broadcasted_iota(jnp.int32, shape, 0) + pl.program_id(0) * tile_rows
    col = lax.broadcasted_iota(jnp.int32, shape, 1)
    idx = row * jnp.int32(ncols) + col

    # Counter-based hash of (seed, flat index) -> 32 random bits per element.
    seed = seed_ref[0]
    h = _mix32(idx ^ (seed * jnp.int32(_GOLDEN)))
    h = _mix32(h + jnp.int32(_GOLDEN))

    # keep  <=>  (h as uint32) >= round(drop_prob * 2^32)
    # Unsigned compare done as a signed compare after flipping the sign bit.
    keep = (h ^ jnp.int32(_SIGN)) >= jnp.int32(threshold_signed)

    x = x_ref[...]
    scaled = x * jnp.asarray(scale, dtype=x.dtype)
    o_ref[...] = jnp.where(keep, scaled, jnp.zeros_like(scaled))


def _choose_layout(total, last_dim, itemsize):
    """Pick a lane-dense (rows, cols) reshape and a row-tile size."""
    ncols = None
    for c in (1024, 512, 256, 128):
        if total % c == 0:
            ncols = c
            break
    if ncols is None:
        ncols = last_dim                  # fallback: last block dim == full dim

    nrows = total // ncols

    target_bytes = 2 * 1024 * 1024        # ~2 MiB per tile (x4 with dbl-buffered in+out)
    tile_rows = max(1, target_bytes // (ncols * itemsize))
    if tile_rows >= nrows:
        tile_rows = nrows                 # single block along rows (== full dim)
    else:
        tile_rows = max(8, (tile_rows // 8) * 8)   # sublane multiple
        tile_rows = min(tile_rows, nrows)
    return nrows, ncols, tile_rows


def stable_dropout(x, drop_prob: float, *, training: bool = True, seed: int = 0):
    """JAX/Pallas equivalent of StableDropout.forward (training forward)."""
    if (not training) or drop_prob <= 0.0:
        return x  # identity path — no kernel needed

    orig_shape = x.shape
    total = int(x.size)
    itemsize = jnp.dtype(x.dtype).itemsize
    nrows, ncols, tile_rows = _choose_layout(total, orig_shape[-1], itemsize)

    # Integer keep/drop threshold: drop iff bits < round(p * 2^32).
    threshold_u = int(round(float(drop_prob) * 4294967296.0))
    threshold_u = max(1, min(threshold_u, 4294967295))
    threshold_signed = threshold_u - 2147483648
    scale = 1.0 / (1.0 - float(drop_prob))

    x2d = x.reshape(nrows, ncols)
    seed_arr = jnp.array([seed], dtype=jnp.int32)

    kernel = functools.partial(
        _stable_dropout_kernel,
        tile_rows=tile_rows,
        ncols=ncols,
        threshold_signed=threshold_signed,
        scale=scale,
    )

    num_tiles = pl.cdiv(nrows, tile_rows)

    out2d = pl.pallas_call(
        kernel,
        out_shape=jax.ShapeDtypeStruct((nrows, ncols), x.dtype),
        grid_spec=pltpu.PrefetchScalarGridSpec(
            num_scalar_prefetch=1,                    # seed -> SMEM
            grid=(num_tiles,),
            in_specs=[pl.BlockSpec((tile_rows, ncols), lambda i, seed: (i, 0))],
            out_specs=pl.BlockSpec((tile_rows, ncols), lambda i, seed: (i, 0)),
        ),
        compiler_params=pltpu.CompilerParams(
            dimension_semantics=("parallel",),        # independent tiles; shards on v7x 2xTC
        ),
        cost_estimate=pl.CostEstimate(
            flops=2 * total,
            transcendentals=0,
            bytes_accessed=2 * total * itemsize,      # 1 read + 1 write of x
        ),
    )(seed_arr, x2d)

    return out2d.reshape(orig_shape)


if __name__ == "__main__":
    key = jax.random.PRNGKey(0)
    batch, seq, hidden = 2, 8, 32
    drop_prob = 0.1

    x = jax.random.normal(key, (batch, seq, hidden), dtype=jnp.float32)

    # Training forward (dropout active).
    y = jax.block_until_ready(stable_dropout(x, drop_prob, training=True, seed=1234))
    assert y.shape == x.shape and y.dtype == x.dtype

    scale = 1.0 / (1.0 - drop_prob)
    dropped = (y == 0.0) & (x != 0.0)
    kept = ~dropped

    # Surviving elements are exactly x / (1 - p); dropped elements are exactly 0.
    assert bool(jnp.all(jnp.where(kept, jnp.abs(y - x * scale) < 1e-5, True)))
    assert bool(jnp.all(jnp.where(dropped, y == 0.0, True)))

    # Some (but not an absurd number of) elements are dropped.
    frac = float(jnp.mean(dropped.astype(jnp.float32)))
    assert 0.0 < frac < 0.5, frac

    # Deterministic for a fixed seed.
    y2 = jax.block_until_ready(stable_dropout(x, drop_prob, training=True, seed=1234))
    assert bool(jnp.all(y == y2))

    # Eval forward and p == 0 are identity.
    y_eval = jax.block_until_ready(stable_dropout(x, drop_prob, training=False))
    assert bool(jnp.all(y_eval == x))
    y_p0 = jax.block_until_ready(stable_dropout(x, 0.0, training=True))
    assert bool(jnp.all(y_p0 == x))

    print("KERNEL_OK")
</pallas_src>

<mosaic_0001>
module attributes {stable_mosaic.version = 11 : i64} {
  func.func @_stable_dropout_kernel(%arg0: i32, %arg1: memref<1xi32, #tpu.memory_space<smem>>, %arg2: memref<1x512xf32, #tpu.memory_space<vmem>>, %arg3: memref<1x512xf32, #tpu.memory_space<vmem>>) attributes {dimension_semantics = [#tpu.dimension_semantics<parallel>], iteration_bounds = array<i64: 1>, scalar_prefetch = 1 : i64, scratch_operands = 0 : i64, tpu.core_type = #tpu.core_type<tc>, window_params = [{transform_indices = @transform_0, window_bounds = array<i64: 1, 512>}, {transform_indices = @transform_1, window_bounds = array<i64: 1, 512>}]} {
    %0 = tpu.iota {dimensions = array<i32: 0>} : vector<1x512xi32>
    %c1_i32 = arith.constant 1 : i32
    %1 = arith.muli %arg0, %c1_i32 : i32
    %2 = vector.broadcast %1 : i32 to vector<1x512xi32>
    %3 = arith.addi %0, %2 : vector<1x512xi32>
    %4 = tpu.iota {dimensions = array<i32: 1>} : vector<1x512xi32>
    %c512_i32 = arith.constant 512 : i32
    %5 = vector.broadcast %c512_i32 : i32 to vector<1x512xi32>
    %6 = arith.muli %3, %5 : vector<1x512xi32>
    %7 = arith.addi %6, %4 : vector<1x512xi32>
    %c0 = arith.constant 0 : index
    %8 = memref.load %arg1[%c0] : memref<1xi32, #tpu.memory_space<smem>>
    %c-1640531527_i32 = arith.constant -1640531527 : i32
    %9 = arith.muli %8, %c-1640531527_i32 : i32
    %10 = vector.broadcast %9 : i32 to vector<1x512xi32>
    %11 = arith.xori %7, %10 : vector<1x512xi32>
    %c16_i32 = arith.constant 16 : i32
    %12 = vector.broadcast %c16_i32 : i32 to vector<1x512xi32>
    %13 = arith.shrsi %11, %12 : vector<1x512xi32>
    %c65535_i32 = arith.constant 65535 : i32
    %14 = vector.broadcast %c65535_i32 : i32 to vector<1x512xi32>
    %15 = arith.andi %13, %14 : vector<1x512xi32>
    %16 = arith.xori %11, %15 : vector<1x512xi32>
    %c-2048144789_i32 = arith.constant -2048144789 : i32
    %17 = vector.broadcast %c-2048144789_i32 : i32 to vector<1x512xi32>
    %18 = arith.muli %16, %17 : vector<1x512xi32>
    %c13_i32 = arith.constant 13 : i32
    %19 = vector.broadcast %c13_i32 : i32 to vector<1x512xi32>
    %20 = arith.shrsi %18, %19 : vector<1x512xi32>
    %c524287_i32 = arith.constant 524287 : i32
    %21 = vector.broadcast %c524287_i32 : i32 to vector<1x512xi32>
    %22 = arith.andi %20, %21 : vector<1x512xi32>
    %23 = arith.xori %18, %22 : vector<1x512xi32>
    %c-1028477387_i32 = arith.constant -1028477387 : i32
    %24 = vector.broadcast %c-1028477387_i32 : i32 to vector<1x512xi32>
    %25 = arith.muli %23, %24 : vector<1x512xi32>
    %c16_i32_0 = arith.constant 16 : i32
    %26 = vector.broadcast %c16_i32_0 : i32 to vector<1x512xi32>
    %27 = arith.shrsi %25, %26 : vector<1x512xi32>
    %c65535_i32_1 = arith.constant 65535 : i32
    %28 = vector.broadcast %c65535_i32_1 : i32 to vector<1x512xi32>
    %29 = arith.andi %27, %28 : vector<1x512xi32>
    %30 = arith.xori %25, %29 : vector<1x512xi32>
    %c-1640531527_i32_2 = arith.constant -1640531527 : i32
    %31 = vector.broadcast %c-1640531527_i32_2 : i32 to vector<1x512xi32>
    %32 = arith.addi %30, %31 : vector<1x512xi32>
    %c16_i32_3 = arith.constant 16 : i32
    %33 = vector.broadcast %c16_i32_3 : i32 to vector<1x512xi32>
    %34 = arith.shrsi %32, %33 : vector<1x512xi32>
    %c65535_i32_4 = arith.constant 65535 : i32
    %35 = vector.broadcast %c65535_i32_4 : i32 to vector<1x512xi32>
    %36 = arith.andi %34, %35 : vector<1x512xi32>
    %37 = arith.xori %32, %36 : vector<1x512xi32>
    %c-2048144789_i32_5 = arith.constant -2048144789 : i32
    %38 = vector.broadcast %c-2048144789_i32_5 : i32 to vector<1x512xi32>
    %39 = arith.muli %37, %38 : vector<1x512xi32>
    %c13_i32_6 = arith.constant 13 : i32
    %40 = vector.broadcast %c13_i32_6 : i32 to vector<1x512xi32>
    %41 = arith.shrsi %39, %40 : vector<1x512xi32>
    %c524287_i32_7 = arith.constant 524287 : i32
    %42 = vector.broadcast %c524287_i32_7 : i32 to vector<1x512xi32>
    %43 = arith.andi %41, %42 : vector<1x512xi32>
    %44 = arith.xori %39, %43 : vector<1x512xi32>
    %c-1028477387_i32_8 = arith.constant -1028477387 : i32
    %45 = vector.broadcast %c-1028477387_i32_8 : i32 to vector<1x512xi32>
    %46 = arith.muli %44, %45 : vector<1x512xi32>
    %c16_i32_9 = arith.constant 16 : i32
    %47 = vector.broadcast %c16_i32_9 : i32 to vector<1x512xi32>
    %48 = arith.shrsi %46, %47 : vector<1x512xi32>
    %c65535_i32_10 = arith.constant 65535 : i32
    %49 = vector.broadcast %c65535_i32_10 : i32 to vector<1x512xi32>
    %50 = arith.andi %48, %49 : vector<1x512xi32>
    %51 = arith.xori %46, %50 : vector<1x512xi32>
    %c-2147483648_i32 = arith.constant -2147483648 : i32
    %52 = vector.broadcast %c-2147483648_i32 : i32 to vector<1x512xi32>
    %53 = arith.xori %51, %52 : vector<1x512xi32>
    %c-1717986918_i32 = arith.constant -1717986918 : i32
    %54 = vector.broadcast %c-1717986918_i32 : i32 to vector<1x512xi32>
    %55 = arith.cmpi sge, %53, %54 : vector<1x512xi32>
    %c0_11 = arith.constant 0 : index
    %c0_12 = arith.constant 0 : index
    %56 = vector.load %arg2[%c0_11, %c0_12] : memref<1x512xf32, #tpu.memory_space<vmem>>, vector<1x512xf32>
    %cst = arith.constant 1.11111116 : f32
    %57 = vector.broadcast %cst : f32 to vector<1x512xf32>
    %58 = arith.mulf %56, %57 : vector<1x512xf32>
    %cst_13 = arith.constant 0.000000e+00 : f32
    %59 = vector.broadcast %cst_13 : f32 to vector<1x512xf32>
    %60 = arith.select %55, %58, %59 : vector<1x512xi1>, vector<1x512xf32>
    %c0_14 = arith.constant 0 : index
    %c0_15 = arith.constant 0 : index
    %61 = vector.load %arg3[%c0_14, %c0_15] : memref<1x512xf32, #tpu.memory_space<vmem>>, vector<1x512xf32>
    tpu.vector_store %arg3[%c0_14, %c0_15], %60 {strides = array<i32>} : memref<1x512xf32, #tpu.memory_space<vmem>>, vector<1x512xf32>,
    return
  }
  func.func @transform_0(%arg0: i32, %arg1: memref<1xi32, #tpu.memory_space<smem>>) -> (i32, i32) {
    %c0_i32 = arith.constant 0 : i32
    %c0_i32_0 = arith.constant 0 : i32
    return %arg0, %c0_i32 : i32, i32
  }
  func.func @transform_1(%arg0: i32, %arg1: memref<1xi32, #tpu.memory_space<smem>>) -> (i32, i32) {
    %c0_i32 = arith.constant 0 : i32
    %c0_i32_0 = arith.constant 0 : i32
    return %arg0, %c0_i32 : i32, i32
  }
}

</mosaic_0001>

<bundles_post_ra>
// kernel: tpu_custom_call.1
= control target key start
LH: loop header
LB: loop body
LE: loop exit
PB: predicated region body
PF: predicated region fallthrough
CT: control target
= control target key end

     0   :  { %8 = vsyncpa [#allocation5], 0  ;;  %s351_s0 = inlined_call_operand.<no memory space> [shape: s32[1], index: 0, kind: input, shape index: {}]   ;;  %s352_s1 = inlined_call_operand.hbm [shape: f32[1,512], index: 1, kind: input, shape index: {}]   ;;  %s353_s2 = inlined_call_operand.hbm [shape: f32[1,512], index: 2, kind: output, shape index: {}]  }
   0x1   :  { %9 = vsyncpa [#allocation6], 0  ;;  %s295_s9 = smov [#allocation4]   ;;  %s247_s13 = scalar_lea.hbm %s352_s1, 64 }
   0x2   :  { %s16_s10 = sshll.u32 %s295_s9, 4  ;;  %p248_p0 = scmp.ne.s32.totalorder %s352_s1, %s247_s13  ;;  %s17_s10 = int_to_ptr.vmem [resolvable:$true] %s16_s10 }
   0x3   :  { %p251_p1 = scmp.lt.u32.totalorder %s247_s13, %s352_s1 }
   0x5   :  { %p253_p2 = pnand %p251_p1, %p248_p0 }
   0x7   :  { %256 = shalt.err (!%p253_p2)
}
   0x8   :  { %s257_s18 = scalar_lea.vmem %s17_s10, 64  ;;  %p262_p4 = scmp.lt.s32.totalorder %s17_s10, %s17_s10 }
   0x9   :  { %p258_p3 = scmp.ne.s32.totalorder %s17_s10, %s257_s18  ;;  %p263_p5 = scmp.lt.s32.totalorder %s257_s18, %s257_s18 }
   0xb   :  { %p264_p6 = por %p263_p5, %p262_p4 }
   0xd   :  { %p265_p7 = pnand %p264_p6, %p258_p3 }
   0xf   :  { %268 = shalt.err (!%p265_p7)
}
  0x10   :  { %19 = dma.hbm_to_vmem [thread:$0]  %s352_s1, 64, %s17_s10, [#allocation5]  }
  0x11   :  { %291 = dma.done.wait [#allocation5], 64  }
  0x12   :  { %292 = vsyncadd [#allocation5], 4294967232  ;;  %v23_v0 = vlaneseq  ;;  %s38_s23 = smul.u32 2654435769, %s351_s0  ;;  %s297_s0 = smov [#allocation7]  }
  0x13   :  { %s211_s1 = sshll.u32 %s297_s0, 4  ;;  %s212_s1 = int_to_ptr.vmem [resolvable:$true] %s211_s1 }
  0x14   :  { %v329_v1 = vshrl.u32 %v23_v0, 7  ;;  %v28_v2 = vand.u32 127, %v23_v0  ;;  %v39_v7 = vstv %s38_s23  ;;  %vm202_vm4 = vcmp.lt.s32.totalorder %v23_v0, 512  ;;  %s269_s24 = scalar_lea.vmem %s212_s1, 64  ;;  %p274_p9 = scmp.lt.s32.totalorder %s212_s1, %s212_s1 }
  0x15   :  { %p270_p8 = scmp.ne.s32.totalorder %s212_s1, %s269_s24  ;;  %p275_p10 = scmp.lt.s32.totalorder %s269_s24, %s269_s24 }
  0x16   :  { %v29_v3 = vadd.s32 128, %v28_v2  ;;  %v30_v4 = vadd.s32 256, %v28_v2  ;;  %v31_v5 = vadd.s32 384, %v28_v2  ;;  %v32_v6 = vmul.u32 512, %v329_v1 }
  0x17   :  { %p276_p11 = por %p275_p10, %p274_p9 }
  0x18   :  { %v33_v8 = vadd.s32 %v32_v6, %v28_v2  ;;  %v34_v9 = vadd.s32 %v32_v6, %v29_v3  ;;  %v35_v10 = vadd.s32 %v32_v6, %v30_v4  ;;  %v36_v11 = vadd.s32 %v32_v6, %v31_v5  ;;  %v144_v6 = vld [vmem:[#allocation4] sm:$0xf] }
  0x19   :  { %p277_p12 = pnand %p276_p11, %p270_p8 }
  0x1a   :  { %v40_v12 = vxor.u32 %v39_v7, %v33_v8  ;;  %v41_v13 = vxor.u32 %v39_v7, %v34_v9  ;;  %v42_v14 = vxor.u32 %v39_v7, %v35_v10  ;;  %v43_v15 = vxor.u32 %v39_v7, %v36_v11 }
  0x1b   :  { %v296_v11 = vmov 1966171168  }
  0x1c   :  { %v220_v16 = vshrl.u32 %v40_v12, 16  ;;  %v221_v17 = vshrl.u32 %v41_v13, 16  ;;  %v222_v18 = vshrl.u32 %v42_v14, 16  ;;  %v223_v19 = vshrl.u32 %v43_v15, 16 }
  0x1e   :  { %v52_v20 = vxor.u32 %v220_v16, %v40_v12  ;;  %v53_v21 = vxor.u32 %v221_v17, %v41_v13  ;;  %v54_v22 = vxor.u32 %v222_v18, %v42_v14  ;;  %v55_v23 = vxor.u32 %v223_v19, %v43_v15 }
  0x1f   :  { %v178_v12 = vunpack.c.l.s4 %v296_v11  ;;  %v149_v15 = vsub.s32 0, %v329_v1  ;;  %v153_v16 = vsub.s32 1, %v329_v1  ;;  %v145_v17 = vmul.f32 1.1111112, %v144_v6 }
  0x20   :  { %v56_v24 = vmul.u32 2246822507, %v52_v20  ;;  %v57_v25 = vmul.u32 2246822507, %v53_v21 }
  0x21   :  { %v58_v26 = vmul.u32 2246822507, %v54_v22  ;;  %v59_v27 = vmul.u32 2246822507, %v55_v23  ;;  %v157_v22 = vsub.s32 2, %v329_v1  ;;  %v161_v23 = vsub.s32 3, %v329_v1 }
  0x22   :  { %v224_v28 = vshrl.u32 %v56_v24, 13  ;;  %v225_v29 = vshrl.u32 %v57_v25, 13 }
  0x23   :  { %v226_v30 = vshrl.u32 %v58_v26, 13  ;;  %v227_v31 = vshrl.u32 %v59_v27, 13 }
  0x24   :  { %v68_v32 = vxor.u32 %v224_v28, %v56_v24  ;;  %v69_v33 = vxor.u32 %v225_v29, %v57_v25  ;;  %v179_v28 = vunpack.c.0.s8 %v178_v12 }
  0x25   :  { %v70_v34 = vxor.u32 %v226_v30, %v58_v26  ;;  %v71_v35 = vxor.u32 %v227_v31, %v59_v27  ;;  %v150_v31 = vrot.slane %v145_v17, %v149_v15 }
  0x26   :  { %v72_v36 = vmul.u32 3266489909, %v68_v32  ;;  %v73_v37 = vmul.u32 3266489909, %v69_v33  ;;  %v154_v32 = vrot.slane %v145_v17, %v153_v16 }
  0x27   :  { %v74_v38 = vmul.u32 3266489909, %v70_v34  ;;  %v75_v39 = vmul.u32 3266489909, %v71_v35  ;;  %v158_v35 = vrot.slane %v145_v17, %v157_v22 }
  0x28   :  { %v228_v40 = vshrl.u32 %v72_v36, 16  ;;  %v229_v41 = vshrl.u32 %v73_v37, 16 }
  0x29   :  { %v230_v42 = vshrl.u32 %v74_v38, 16  ;;  %v231_v43 = vshrl.u32 %v75_v39, 16 }
  0x2a   :  { %v84_v44 = vxor.u32 %v228_v40, %v72_v36  ;;  %v85_v45 = vxor.u32 %v229_v41, %v73_v37  ;;  %v162_v36 = vrot.slane %v145_v17, %v161_v23 }
  0x2b   :  { %v86_v46 = vxor.u32 %v230_v42, %v74_v38  ;;  %v87_v47 = vxor.u32 %v231_v43, %v75_v39  ;;  %v182_v39 = vsub.s32 %v179_v28, %v329_v1 }
  0x2c   :  { %v88_v48 = vadd.s32 2654435769, %v84_v44  ;;  %v89_v49 = vadd.s32 2654435769, %v85_v45 }
  0x2d   :  { %v90_v50 = vadd.s32 2654435769, %v86_v46  ;;  %v91_v51 = vadd.s32 2654435769, %v87_v47 }
  0x2e   :  { %v232_v52 = vshrl.u32 %v88_v48, 16  ;;  %v233_v53 = vshrl.u32 %v89_v49, 16 }
  0x2f   :  { %v234_v54 = vshrl.u32 %v90_v50, 16  ;;  %v235_v55 = vshrl.u32 %v91_v51, 16 }
  0x30   :  { %v100_v56 = vxor.u32 %v232_v52, %v88_v48  ;;  %v101_v57 = vxor.u32 %v233_v53, %v89_v49 }
  0x31   :  { %v102_v58 = vxor.u32 %v234_v54, %v90_v50  ;;  %v103_v59 = vxor.u32 %v235_v55, %v91_v51 }
  0x32   :  { %v104_v60 = vmul.u32 2246822507, %v100_v56  ;;  %v105_v61 = vmul.u32 2246822507, %v101_v57 }
  0x33   :  { %v106_v62 = vmul.u32 2246822507, %v102_v58  ;;  %v107_v63 = vmul.u32 2246822507, %v103_v59 }
  0x34   :  { %v236_v2 = vshrl.u32 %v104_v60, 13  ;;  %v237_v3 = vshrl.u32 %v105_v61, 13 }
  0x35   :  { %v238_v4 = vshrl.u32 %v106_v62, 13  ;;  %v239_v5 = vshrl.u32 %v107_v63, 13 }
  0x36   :  { %v116_v7 = vxor.u32 %v236_v2, %v104_v60  ;;  %v117_v8 = vxor.u32 %v237_v3, %v105_v61 }
  0x37   :  { %v118_v9 = vxor.u32 %v238_v4, %v106_v62  ;;  %v119_v10 = vxor.u32 %v239_v5, %v107_v63 }
  0x38   :  { %v120_v13 = vmul.u32 3266489909, %v116_v7  ;;  %v121_v14 = vmul.u32 3266489909, %v117_v8 }
  0x39   :  { %v122_v18 = vmul.u32 3266489909, %v118_v9  ;;  %v123_v19 = vmul.u32 3266489909, %v119_v10 }
  0x3a   :  { %v240_v20 = vshrl.u32 %v120_v13, 16  ;;  %v241_v21 = vshrl.u32 %v121_v14, 16 }
  0x3b   :  { %v242_v24 = vshrl.u32 %v122_v18, 16  ;;  %v243_v25 = vshrl.u32 %v123_v19, 16 }
  0x3c   :  { %v132_v26 = vxor.u32 %v240_v20, %v120_v13  ;;  %v133_v27 = vxor.u32 %v241_v21, %v121_v14 }
  0x3d   :  { %v134_v29 = vxor.u32 %v242_v24, %v122_v18  ;;  %v135_v30 = vxor.u32 %v243_v25, %v123_v19 }
  0x3e   :  { %v136_v33 = vxor.u32 2147483648, %v132_v26  ;;  %v137_v34 = vxor.u32 2147483648, %v133_v27 }
  0x3f   :  { %v138_v37 = vxor.u32 2147483648, %v134_v29  ;;  %v139_v38 = vxor.u32 2147483648, %v135_v30 }
  0x40   :  { %vm140_vm0 = vcmp.ge.s32.totalorder %v136_v33, 2576980378  ;;  %vm141_vm1 = vcmp.ge.s32.totalorder %v137_v34, 2576980378 }
  0x41   :  { %vm142_vm2 = vcmp.ge.s32.totalorder %v138_v37, 2576980378  ;;  %vm143_vm3 = vcmp.ge.s32.totalorder %v139_v38, 2576980378  ;;  %v167_v40 = vsel %vm140_vm0, %v150_v31, 0.0  ;;  %v168_v41 = vsel %vm141_vm1, %v154_v32, 0.0 }
  0x42   :  { %v169_v42 = vsel %vm142_vm2, %v158_v35, 0.0  ;;  %v170_v43 = vsel %vm143_vm3, %v162_v36, 0.0  ;;  %v175_v44 = vcombine.low %v167_v40, %v168_v41 }
  0x43   :  { %v176_v45 = vcombine.low %v169_v42, %v170_v43 }
  0x44   :  { %v183_v46 = vrot.slane %v175_v44, %v182_v39 }
  0x45   :  { %v190_v47 = vrot.slane %v176_v45, %v182_v39 }
  0x47   :  { %v191_v48 = vcombine.low %v183_v46, %v190_v47 }
  0x49   :  { %v198_v49 = vrot.slane %v191_v48, %v182_v39 }
  0x4b   :  { %204 = vst.msk [vmem:[#allocation7] sm:$0xf] %vm202_vm4, %v198_v49 }
  0x4c   :  { %280 = shalt.err (!%p277_p12)
}
  0x4d   :  { %s281_s27 = scalar_lea.hbm %s353_s2, 64 }
  0x4e   :  { %p282_p13 = scmp.ne.s32.totalorder %s353_s2, %s281_s27  ;;  %p285_p0 = scmp.lt.u32.totalorder %s281_s27, %s353_s2 }
  0x50   :  { %p287_p1 = pnand %p285_p0, %p282_p13 }
  0x52   :  { %290 = shalt.err (!%p287_p1)
}
  0x53   :  { %214 = dma.vmem_to_hbm [thread:$0]  %s212_s1, 64, %s353_s2, [#allocation6]  }
  0x54   :  { %293 = dma.done.wait [#allocation6], 64  }
  0x55   :  { %294 = vsyncadd [#allocation6], 4294967232 }
  0x56   :  { %218 = vsyncpa [#allocation5], 1 }
  0x57   :  { %219 = vsyncpa [#allocation6], 1 }

</bundles_post_ra>
